<compile_context>
chip_gen: v5e
topology: v5e:2x2
jax: 0.10.0
libtpu: 0.0.40
codegen_flags: <defaults>
</compile_context>

<pallas_src>
import functools

import jax
import jax.numpy as jnp
from jax.experimental import pallas as pl
from jax.experimental.pallas import tpu as pltpu

HIDDEN = 128
LANE = 128  # output padded to a multiple of 128 lanes


def dqn_kernel(x_ref, w1_ref, b1_ref, w2_ref, b2_ref, w3_ref, b3_ref, out_ref):
    # Whole MLP for one batch tile lives in VMEM; three matmuls + ReLUs fused.
    # Matmul operands are bf16 (MXU-friendly), accumulation is f32, bias add
    # and ReLU are f32 (v5e VPU has no bf16).
    x = x_ref[...].astype(jnp.bfloat16)               # (tile_b, state_dim)

    h1 = jnp.dot(x, w1_ref[...], preferred_element_type=jnp.float32)
    h1 = jnp.maximum(h1 + b1_ref[...], 0.0)           # f32

    h2 = jnp.dot(h1.astype(jnp.bfloat16), w2_ref[...],
                 preferred_element_type=jnp.float32)
    h2 = jnp.maximum(h2 + b2_ref[...], 0.0)           # f32

    q = jnp.dot(h2.astype(jnp.bfloat16), w3_ref[...],
                preferred_element_type=jnp.float32) + b3_ref[...]

    out_ref[...] = q.astype(out_ref.dtype)            # (tile_b, 128) lane-dense


def _round_up(n, m):
    return ((n + m - 1) // m) * m


def _choose_tile(B):
    """Batch tile size.

    B <= 512: single grid step (block == full padded array) -- per-step
    overhead (~0.35 us) dwarfs the MXU work here, so one step wins.
    B > 512: 512-row tiles (multiple of 256 for v6e, 128 for v5e) which also
    guarantees >= 2 grid steps so v7x can shard across both TensorCores.
    """
    if B <= 512:
        return _round_up(B, 8)  # f32 x tile: sublane = 8
    return 512


@functools.partial(jax.jit, static_argnames=("action_dim",))
def dqn_forward(x, params, action_dim):
    """x: (B, state_dim) f32. params: output of prepare_params()."""
    w1, b1 = params["w1"], params["b1"]
    w2, b2 = params["w2"], params["b2"]
    w3, b3 = params["w3"], params["b3"]          # already bf16 / padded to N_PAD

    B, state_dim = x.shape
    n_pad = w3.shape[1]                          # padded output width (>= 128)

    tile_b = _choose_tile(B)
    b_pad = _round_up(B, tile_b)
    if b_pad != B:
        x = jnp.pad(x, ((0, b_pad - B), (0, 0)))

    grid = (b_pad // tile_b,)

    # Weights/biases: constant index_map -> resident in VMEM across grid steps.
    resident = lambda shape: pl.BlockSpec(shape, lambda i: (0, 0))

    flops = 2 * b_pad * (state_dim * HIDDEN + HIDDEN * HIDDEN + HIDDEN * n_pad)
    bytes_accessed = (
        b_pad * state_dim * 4                              # x (f32 in)
        + (w1.size + w2.size + w3.size) * 2                # bf16 weights
        + (b1.size + b2.size + b3.size) * 4                # f32 biases
        + b_pad * n_pad * 4                                # f32 out (padded)
    )

    out_padded = pl.pallas_call(
        dqn_kernel,
        out_shape=jax.ShapeDtypeStruct((b_pad, n_pad), jnp.float32),
        grid=grid,
        in_specs=[
            pl.BlockSpec((tile_b, state_dim), lambda i: (i, 0)),   # x: batch-tiled
            resident(w1.shape), resident(b1.shape),
            resident(w2.shape), resident(b2.shape),
            resident(w3.shape), resident(b3.shape),
        ],
        out_specs=pl.BlockSpec((tile_b, n_pad), lambda i: (i, 0)),
        compiler_params=pltpu.CompilerParams(
            dimension_semantics=("parallel",),       # megacore sharding on v7x
        ),
        cost_estimate=pl.CostEstimate(
            flops=flops, transcendentals=0, bytes_accessed=bytes_accessed),
    )(x, w1, b1, w2, b2, w3, b3)

    return out_padded[:B, :action_dim]


def init_params(key, state_dim, action_dim, hidden=HIDDEN):
    """Deterministic synthetic init mimicking PyTorch Linear default
    (uniform in [-1/sqrt(fan_in), 1/sqrt(fan_in)]). Weights in (in, out)."""
    ks = jax.random.split(key, 6)

    def linear(kw, kb, fan_in, fan_out):
        bound = 1.0 / jnp.sqrt(jnp.float32(fan_in))
        w = jax.random.uniform(kw, (fan_in, fan_out), jnp.float32, -bound, bound)
        b = jax.random.uniform(kb, (1, fan_out), jnp.float32, -bound, bound)
        return w, b

    w1, b1 = linear(ks[0], ks[1], state_dim, hidden)
    w2, b2 = linear(ks[2], ks[3], hidden, hidden)
    w3, b3 = linear(ks[4], ks[5], hidden, action_dim)
    return {"w1": w1, "b1": b1, "w2": w2, "b2": b2, "w3": w3, "b3": b3}


def prepare_params(params_f32):
    """One-time (out of the per-call path): cast weights to bf16 and zero-pad
    the last layer to a lane-dense 128-multiple output width."""
    action_dim = params_f32["w3"].shape[1]
    n_pad = _round_up(action_dim, LANE)

    w3p = jnp.zeros((HIDDEN, n_pad), jnp.float32).at[:, :action_dim].set(
        params_f32["w3"])
    b3p = jnp.zeros((1, n_pad), jnp.float32).at[:, :action_dim].set(
        params_f32["b3"])

    return {
        "w1": params_f32["w1"].astype(jnp.bfloat16), "b1": params_f32["b1"],
        "w2": params_f32["w2"].astype(jnp.bfloat16), "b2": params_f32["b2"],
        "w3": w3p.astype(jnp.bfloat16), "b3": b3p,
    }


def dqn_reference_f32(x, p):
    h1 = jnp.maximum(x @ p["w1"] + p["b1"], 0.0)
    h2 = jnp.maximum(h1 @ p["w2"] + p["b2"], 0.0)
    return h2 @ p["w3"] + p["b3"]


def dqn_reference_bf16(x, p):
    # Mirrors the kernel's bf16-operand / f32-accumulate numerics.
    bf = jnp.bfloat16
    h1 = jnp.dot(x.astype(bf), p["w1"].astype(bf),
                 preferred_element_type=jnp.float32) + p["b1"]
    h1 = jnp.maximum(h1, 0.0)
    h2 = jnp.dot(h1.astype(bf), p["w2"].astype(bf),
                 preferred_element_type=jnp.float32) + p["b2"]
    h2 = jnp.maximum(h2, 0.0)
    return jnp.dot(h2.astype(bf), p["w3"].astype(bf),
                   preferred_element_type=jnp.float32) + p["b3"]


if __name__ == "__main__":
    key = jax.random.PRNGKey(0)
    k_param, k_x1, k_x2 = jax.random.split(key, 3)

    # Small, forward-consistent shapes: states of dim 4, 2 actions.
    state_dim, action_dim = 4, 2
    params_f32 = init_params(k_param, state_dim, action_dim)
    params = prepare_params(params_f32)

    def check(batch, k):
        x = jax.random.normal(k, (batch, state_dim), jnp.float32)
        out = jax.block_until_ready(dqn_forward(x, params, action_dim))
        assert out.shape == (batch, action_dim)
        # Tight check vs a reference with matching bf16-operand numerics.
        ref_bf16 = dqn_reference_bf16(x, params_f32)
        assert jnp.allclose(out, ref_bf16, atol=1e-3, rtol=1e-3), \
            f"B={batch}: mismatch vs bf16-operand JAX reference"
        # Looser sanity check vs the pure-f32 reference (bf16 quantization).
        ref_f32 = dqn_reference_f32(x, params_f32)
        assert jnp.allclose(out, ref_f32, atol=5e-2, rtol=5e-2), \
            f"B={batch}: mismatch vs f32 JAX reference"

    # Single-grid-step path (small inference batch, B not a multiple of 128).
    check(200, k_x1)
    # Multi-step path (replay-style batch: 1100 -> padded to 1536, 3 tiles).
    check(1100, k_x2)

    print("KERNEL_OK")
</pallas_src>

<mosaic_0001>
module attributes {stable_mosaic.version = 11 : i64} {
  func.func @dqn_kernel(%arg0: i32, %arg1: memref<200x4xf32, #tpu.memory_space<vmem>>, %arg2: memref<4x128xbf16, #tpu.memory_space<vmem>>, %arg3: memref<1x128xf32, #tpu.memory_space<vmem>>, %arg4: memref<128x128xbf16, #tpu.memory_space<vmem>>, %arg5: memref<1x128xf32, #tpu.memory_space<vmem>>, %arg6: memref<128x128xbf16, #tpu.memory_space<vmem>>, %arg7: memref<1x128xf32, #tpu.memory_space<vmem>>, %arg8: memref<200x128xf32, #tpu.memory_space<vmem>>) attributes {dimension_semantics = [#tpu.dimension_semantics<parallel>], iteration_bounds = array<i64: 1>, scalar_prefetch = 0 : i64, scratch_operands = 0 : i64, tpu.core_type = #tpu.core_type<tc>, window_params = [{transform_indices = @transform_0, window_bounds = array<i64: 200, 4>}, {pipeline_mode = #tpu.pipeline_mode<synchronous>, transform_indices = @transform_1, window_bounds = array<i64: 4, 128>}, {pipeline_mode = #tpu.pipeline_mode<synchronous>, transform_indices = @transform_2, window_bounds = array<i64: 1, 128>}, {pipeline_mode = #tpu.pipeline_mode<synchronous>, transform_indices = @transform_3, window_bounds = array<i64: 128, 128>}, {pipeline_mode = #tpu.pipeline_mode<synchronous>, transform_indices = @transform_4, window_bounds = array<i64: 1, 128>}, {pipeline_mode = #tpu.pipeline_mode<synchronous>, transform_indices = @transform_5, window_bounds = array<i64: 128, 128>}, {pipeline_mode = #tpu.pipeline_mode<synchronous>, transform_indices = @transform_6, window_bounds = array<i64: 1, 128>}, {transform_indices = @transform_7, window_bounds = array<i64: 200, 128>}]} {
    %c0 = arith.constant 0 : index
    %c0_0 = arith.constant 0 : index
    %0 = vector.load %arg1[%c0, %c0_0] : memref<200x4xf32, #tpu.memory_space<vmem>>, vector<200x4xf32>
    %1 = arith.truncf %0 : vector<200x4xf32> to vector<200x4xbf16>
    %c0_1 = arith.constant 0 : index
    %c0_2 = arith.constant 0 : index
    %2 = vector.load %arg2[%c0_1, %c0_2] : memref<4x128xbf16, #tpu.memory_space<vmem>>, vector<4x128xbf16>
    %cst = arith.constant dense<0.000000e+00> : vector<200x128xf32>
    %3 = tpu.matmul %1, %2, %cst {dimension_numbers = #tpu.dot_dimension_numbers<[1], [0], [0], [1], [0, 0, 1, 1], [], []>} : vector<200x4xbf16>, vector<4x128xbf16>, vector<200x128xf32> -> vector<200x128xf32>
    %c0_3 = arith.constant 0 : index
    %c0_4 = arith.constant 0 : index
    %4 = vector.load %arg3[%c0_3, %c0_4] : memref<1x128xf32, #tpu.memory_space<vmem>>, vector<1x128xf32>
    %5 = vector.broadcast %4 : vector<1x128xf32> to vector<200x128xf32>
    %6 = arith.addf %3, %5 : vector<200x128xf32>
    %cst_5 = arith.constant 0.000000e+00 : f32
    %7 = vector.broadcast %cst_5 : f32 to vector<200x128xf32>
    %8 = arith.maximumf %6, %7 : vector<200x128xf32>
    %9 = arith.truncf %8 : vector<200x128xf32> to vector<200x128xbf16>
    %c0_6 = arith.constant 0 : index
    %c0_7 = arith.constant 0 : index
    %10 = vector.load %arg4[%c0_6, %c0_7] : memref<128x128xbf16, #tpu.memory_space<vmem>>, vector<128x128xbf16>
    %cst_8 = arith.constant dense<0.000000e+00> : vector<200x128xf32>
    %11 = tpu.matmul %9, %10, %cst_8 {dimension_numbers = #tpu.dot_dimension_numbers<[1], [0], [0], [1], [0, 0, 1, 1], [], []>} : vector<200x128xbf16>, vector<128x128xbf16>, vector<200x128xf32> -> vector<200x128xf32>
    %c0_9 = arith.constant 0 : index
    %c0_10 = arith.constant 0 : index
    %12 = vector.load %arg5[%c0_9, %c0_10] : memref<1x128xf32, #tpu.memory_space<vmem>>, vector<1x128xf32>
    %13 = vector.broadcast %12 : vector<1x128xf32> to vector<200x128xf32>
    %14 = arith.addf %11, %13 : vector<200x128xf32>
    %cst_11 = arith.constant 0.000000e+00 : f32
    %15 = vector.broadcast %cst_11 : f32 to vector<200x128xf32>
    %16 = arith.maximumf %14, %15 : vector<200x128xf32>
    %17 = arith.truncf %16 : vector<200x128xf32> to vector<200x128xbf16>
    %c0_12 = arith.constant 0 : index
    %c0_13 = arith.constant 0 : index
    %18 = vector.load %arg6[%c0_12, %c0_13] : memref<128x128xbf16, #tpu.memory_space<vmem>>, vector<128x128xbf16>
    %cst_14 = arith.constant dense<0.000000e+00> : vector<200x128xf32>
    %19 = tpu.matmul %17, %18, %cst_14 {dimension_numbers = #tpu.dot_dimension_numbers<[1], [0], [0], [1], [0, 0, 1, 1], [], []>} : vector<200x128xbf16>, vector<128x128xbf16>, vector<200x128xf32> -> vector<200x128xf32>
    %c0_15 = arith.constant 0 : index
    %c0_16 = arith.constant 0 : index
    %20 = vector.load %arg7[%c0_15, %c0_16] : memref<1x128xf32, #tpu.memory_space<vmem>>, vector<1x128xf32>
    %21 = vector.broadcast %20 : vector<1x128xf32> to vector<200x128xf32>
    %22 = arith.addf %19, %21 : vector<200x128xf32>
    %c0_17 = arith.constant 0 : index
    %c0_18 = arith.constant 0 : index
    %23 = vector.load %arg8[%c0_17, %c0_18] : memref<200x128xf32, #tpu.memory_space<vmem>>, vector<200x128xf32>
    tpu.vector_store %arg8[%c0_17, %c0_18], %22 {strides = array<i32>} : memref<200x128xf32, #tpu.memory_space<vmem>>, vector<200x128xf32>,
    return
  }
  func.func @transform_0(%arg0: i32) -> (i32, i32) {
    %c0_i32 = arith.constant 0 : i32
    %c0_i32_0 = arith.constant 0 : i32
    return %arg0, %c0_i32 : i32, i32
  }
  func.func @transform_1(%arg0: i32) -> (i32, i32) {
    %c0_i32 = arith.constant 0 : i32
    %c0_i32_0 = arith.constant 0 : i32
    %c0_i32_1 = arith.constant 0 : i32
    return %c0_i32, %c0_i32_0 : i32, i32
  }
  func.func @transform_2(%arg0: i32) -> (i32, i32) {
    %c0_i32 = arith.constant 0 : i32
    %c0_i32_0 = arith.constant 0 : i32
    %c0_i32_1 = arith.constant 0 : i32
    return %c0_i32, %c0_i32_0 : i32, i32
  }
  func.func @transform_3(%arg0: i32) -> (i32, i32) {
    %c0_i32 = arith.constant 0 : i32
    %c0_i32_0 = arith.constant 0 : i32
    %c0_i32_1 = arith.constant 0 : i32
    return %c0_i32, %c0_i32_0 : i32, i32
  }
  func.func @transform_4(%arg0: i32) -> (i32, i32) {
    %c0_i32 = arith.constant 0 : i32
    %c0_i32_0 = arith.constant 0 : i32
    %c0_i32_1 = arith.constant 0 : i32
    return %c0_i32, %c0_i32_0 : i32, i32
  }
  func.func @transform_5(%arg0: i32) -> (i32, i32) {
    %c0_i32 = arith.constant 0 : i32
    %c0_i32_0 = arith.constant 0 : i32
    %c0_i32_1 = arith.constant 0 : i32
    return %c0_i32, %c0_i32_0 : i32, i32
  }
  func.func @transform_6(%arg0: i32) -> (i32, i32) {
    %c0_i32 = arith.constant 0 : i32
    %c0_i32_0 = arith.constant 0 : i32
    %c0_i32_1 = arith.constant 0 : i32
    return %c0_i32, %c0_i32_0 : i32, i32
  }
  func.func @transform_7(%arg0: i32) -> (i32, i32) {
    %c0_i32 = arith.constant 0 : i32
    %c0_i32_0 = arith.constant 0 : i32
    return %arg0, %c0_i32 : i32, i32
  }
}

</mosaic_0001>

<bundles_post_ra>
// kernel: dqn_forward.1
= control target key start
LH: loop header
LB: loop body
LE: loop exit
PB: predicated region body
PF: predicated region fallthrough
CT: control target
= control target key end

     0   :  { %vm110_vm0 = vcmask 1041408   ;;  %vm70_vm1 = vcmask 31744   ;;  %s1031_s1 = inlined_call_operand.vmem [shape: bf16[4,128], index: 1, kind: input, shape index: {}]   ;;  %s1032_s0 = inlined_call_operand.vmem [shape: f32[200,4], index: 0, kind: input, shape index: {}]   ;;  %s1033_s2 = inlined_call_operand.vmem [shape: f32[1,128], index: 2, kind: input, shape index: {}]   ;;  %s1034_s3 = inlined_call_operand.vmem [shape: bf16[128,128], index: 3, kind: input, shape index: {}]   ;;  %s1035_s4 = inlined_call_operand.vmem [shape: f32[1,128], index: 4, kind: input, shape index: {}]   ;;  %s1036_s5 = inlined_call_operand.vmem [shape: bf16[128,128], index: 5, kind: input, shape index: {}]   ;;  %s1037_s6 = inlined_call_operand.vmem [shape: f32[1,128], index: 6, kind: input, shape index: {}]   ;;  %s1038_s7 = inlined_call_operand.vmem [shape: f32[200,128], index: 7, kind: output, shape index: {}]  }
   0x1   :  { %v65_v0 = vld [vmem:[%s1031_s1] sm:$0x3]  ;;  %v28_v2 = vld [vmem:[%s1032_s0 + $0x8] sm:$0xff]  ;;  %v29_v5 = vld [vmem:[%s1032_s0 + $0x10] sm:$0xff] }
   0x2   :  { %v27_v1 = vld [vmem:[%s1032_s0] sm:$0xff]  ;;  %v112_v3 = vsel %vm110_vm0, %v65_v0, 0  ;;  %v30_v6 = vld [vmem:[%s1032_s0 + $0x18] sm:$0xff]  ;;  %v32_v9 = vld [vmem:[%s1032_s0 + $0x28] sm:$0xff] }
   0x3   :  { %v52_v4 = vpack.c.bf16 %v28_v2, %v27_v1  ;;  %121 = vmatpush.bf16.msra.mxu0 %v112_v3  ;;  %667 = vmatpush.bf16.msra.mxu3 %v112_v3  ;;  %v53_v7 = vpack.c.bf16 %v30_v6, %v29_v5  ;;  %v31_v8 = vld [vmem:[%s1032_s0 + $0x20] sm:$0xff]  ;;  %v33_v11 = vld [vmem:[%s1032_s0 + $0x30] sm:$0xff]  ;;  %v34_v12 = vld [vmem:[%s1032_s0 + $0x38] sm:$0xff] }
   0x4   :  { %v54_v10 = vpack.c.bf16 %v32_v9, %v31_v8  ;;  %v55_v13 = vpack.c.bf16 %v34_v12, %v33_v11  ;;  %v35_v14 = vld [vmem:[%s1032_s0 + $0x40] sm:$0xff]  ;;  %v36_v15 = vld [vmem:[%s1032_s0 + $0x48] sm:$0xff]  ;;  %v658_v17 = vld [vmem:[%s1034_s3 + $0x38] sm:$0xff] }
   0x5   :  { %v56_v16 = vpack.c.bf16 %v36_v15, %v35_v14  ;;  %293 = vmatpush.bf16.msra.mxu1 %v658_v17  ;;  %v37_v18 = vld [vmem:[%s1032_s0 + $0x50] sm:$0xff]  ;;  %v38_v19 = vld [vmem:[%s1032_s0 + $0x58] sm:$0xff]  ;;  %v656_v22 = vld [vmem:[%s1034_s3 + $0x28] sm:$0xff] }
   0x6   :  { %574 = vmatmul.msk.bf16.vlgmr.msra.gmra.mxu0 %vm70_vm1, %v52_v4  ;;  %v57_v20 = vpack.c.bf16 %v38_v19, %v37_v18  ;;  %v657_v21 = vld [vmem:[%s1034_s3 + $0x30] sm:$0xff]  ;;  %v655_v23 = vld [vmem:[%s1034_s3 + $0x20] sm:$0xff]  ;;  %v40_v25 = vld [vmem:[%s1032_s0 + $0x68] sm:$0xff] }
   0x7   :  { %668 = vmatpush.bf16.msrb.mxu3 %v658_v17  ;;  %v39_v24 = vld [vmem:[%s1032_s0 + $0x60] sm:$0xff]  ;;  %v654_v26 = vld [vmem:[%s1034_s3 + $0x18] sm:$0xff]  ;;  %v653_v28 = vld [vmem:[%s1034_s3 + $0x10] sm:$0xff] }
   0x8   :  { %v58_v27 = vpack.c.bf16 %v40_v25, %v39_v24  ;;  %v652_v29 = vld [vmem:[%s1034_s3 + $0x8] sm:$0xff]  ;;  %v651_v30 = vld [vmem:[%s1034_s3] sm:$0xff]  ;;  %v41_v31 = vld [vmem:[%s1032_s0 + $0x70] sm:$0xff] }
   0x9   :  { %294 = vmatpush.bf16.msra.mxu1 %v657_v21  ;;  %v42_v32 = vld [vmem:[%s1032_s0 + $0x78] sm:$0xff]  ;;  %v43_v34 = vld [vmem:[%s1032_s0 + $0x80] sm:$0xff]  ;;  %v44_v35 = vld [vmem:[%s1032_s0 + $0x88] sm:$0xff] }
   0xa   :  { %v59_v33 = vpack.c.bf16 %v42_v32, %v41_v31  ;;  %v60_v36 = vpack.c.bf16 %v44_v35, %v43_v34  ;;  %v49_v38 = vld [vmem:[%s1032_s0 + $0xb0] sm:$0xff]  ;;  %v50_v39 = vld [vmem:[%s1032_s0 + $0xb8] sm:$0xff]  ;;  %v825_v40 = vld [vmem:[%s1033_s2] ss:$0 sm:$0xff] }
   0xb   :  { %669 = vmatpush.bf16.msrb.mxu3 %v657_v21  ;;  %v63_v41 = vpack.c.bf16 %v50_v39, %v49_v38  ;;  %v45_v47 = vld [vmem:[%s1032_s0 + $0x90] sm:$0xff]  ;;  %v46_v48 = vld [vmem:[%s1032_s0 + $0x98] sm:$0xff]  ;;  %v47_v57 = vld [vmem:[%s1032_s0 + $0xa0] sm:$0xff] }
   0xc   :  { %v61_v50 = vpack.c.bf16 %v46_v48, %v45_v47  ;;  %v48_v58 = vld [vmem:[%s1032_s0 + $0xa8] sm:$0xff]  ;;  %v51_v62 = vld [vmem:[%s1032_s0 + $0xc0] sm:$0xff]  ;;  %v666_v24 = vld [vmem:[%s1036_s5 + $0x38] sm:$0xff] }
   0xd   :  { %295 = vmatpush.bf16.msra.mxu1 %v656_v22  ;;  %585 = vmatmul.msk.bf16.vlgmr.msra.gmra.mxu3 %vm70_vm1, %v63_v41  ;;  %v62_v60 = vpack.c.bf16 %v48_v58, %v47_v57  ;;  %v64_v63 = vpack.c.bf16 %v51_v62, %v51_v62  ;;  %v663_v31 = vld [vmem:[%s1036_s5 + $0x20] sm:$0xff]  ;;  %v662_v35 = vld [vmem:[%s1036_s5 + $0x18] sm:$0xff]  ;;  %v661_v39 = vld [vmem:[%s1036_s5 + $0x10] sm:$0xff] }
   0xe   :  { %472 = vmatpush.bf16.msra.mxu2 %v666_v24  ;;  %v892_v58 = vld [vmem:[%s1035_s4] ss:$0 sm:$0xff] }
   0xf   :  { %670 = vmatpush.bf16.msrb.mxu3 %v656_v22 }
  0x11   :  { %296 = vmatpush.bf16.msra.mxu1 %v655_v23 }
  0x13   :  { %671 = vmatpush.bf16.msrb.mxu3 %v655_v23 }
  0x15   :  { %297 = vmatpush.bf16.msra.mxu1 %v654_v26 }
  0x16   :  { %575 = vmatmul.msk.bf16.gmra.mxu0 %vm70_vm1, %v53_v7 }
  0x17   :  { %672 = vmatpush.bf16.msrb.mxu3 %v654_v26 }
  0x19   :  { %298 = vmatpush.bf16.msra.mxu1 %v653_v28 }
  0x1b   :  { %673 = vmatpush.bf16.msrb.mxu3 %v653_v28  ;;  %v665_v28 = vld [vmem:[%s1036_s5 + $0x30] sm:$0xff] }
  0x1c   :  { %473 = vmatpush.bf16.msra.mxu2 %v665_v28 }
  0x1d   :  { %299 = vmatpush.bf16.msra.mxu1 %v652_v29  ;;  %586 = vmatmul.msk.bf16.gmra.mxu3 %vm70_vm1, %v64_v63 }
  0x1f   :  { %674 = vmatpush.bf16.msrb.mxu3 %v652_v29 }
  0x21   :  { %300 = vmatpush.bf16.msra.mxu1 %v651_v30 }
  0x23   :  { %675 = vmatpush.bf16.msrb.mxu3 %v651_v30  ;;  %v664_v30 = vld [vmem:[%s1036_s5 + $0x28] sm:$0xff] }
  0x24   :  { %474 = vmatpush.bf16.msra.mxu2 %v664_v30 }
  0x26   :  { %576 = vmatmul.msk.bf16.gmra.mxu0 %vm70_vm1, %v54_v10 }
  0x27   :  { %676 = vmatpush.bf16.msra.mxu3 %v666_v24 }
  0x28   :  { %475 = vmatpush.bf16.msra.mxu2 %v663_v31 }
  0x2b   :  { %677 = vmatpush.bf16.msra.mxu3 %v665_v28 }
  0x2c   :  { %476 = vmatpush.bf16.msra.mxu2 %v662_v35 }
  0x2f   :  { %678 = vmatpush.bf16.msra.mxu3 %v664_v30 }
  0x30   :  { %477 = vmatpush.bf16.msra.mxu2 %v661_v39 }
  0x33   :  { %679 = vmatpush.bf16.msra.mxu3 %v663_v31 }
  0x36   :  { %577 = vmatmul.msk.bf16.gmra.mxu0 %vm70_vm1, %v55_v13 }
  0x37   :  { %680 = vmatpush.bf16.msra.mxu3 %v662_v35 }
  0x3b   :  { %681 = vmatpush.bf16.msra.mxu3 %v661_v39 }
  0x46   :  { %578 = vmatmul.msk.bf16.gmra.mxu0 %vm70_vm1, %v56_v16 }
  0x56   :  { %579 = vmatmul.msk.bf16.gmra.mxu0 %vm70_vm1, %v57_v20 }
  0x66   :  { %580 = vmatmul.msk.bf16.gmra.mxu0 %vm70_vm1, %v58_v27 }
  0x76   :  { %581 = vmatmul.msk.bf16.gmra.mxu0 %vm70_vm1, %v59_v33 }
  0x83   :  { %v123_v37 = vpop.f32.mrf.mxu0 }
  0x84   :  { %v124_v42 = vadd.f32 %v825_v40, %v123_v37 }
  0x86   :  { %582 = vmatmul.msk.bf16.gmra.mxu0 %vm70_vm1, %v60_v36  ;;  %v187_v45 = vmax.f32 %v124_v42, 0.0  ;;  %v660_v42 = vld [vmem:[%s1036_s5 + $0x8] sm:$0xff] }
  0x87   :  { %478 = vmatpush.bf16.msra.mxu2 %v660_v42  ;;  %682 = vmatpush.bf16.msra.mxu3 %v660_v42 }
  0x8b   :  { %v125_v43 = vpop.f32.mrf.mxu0 }
  0x8c   :  { %v126_v44 = vadd.f32 %v825_v40, %v125_v43  ;;  %v659_v43 = vld [vmem:[%s1036_s5] sm:$0xff] }
  0x8d   :  { %479 = vmatpush.bf16.msra.mxu2 %v659_v43  ;;  %683 = vmatpush.bf16.msra.mxu3 %v659_v43 }
  0x8e   :  { %v188_v46 = vmax.f32 %v126_v44, 0.0 }
  0x90   :  { %v212_v49 = vpack.c.bf16 %v188_v46, %v187_v45  ;;  %v178_v63 = vpop.f32.mrf.mxu3 }
  0x92   :  { %301 = vmatmul.bf16.vlgmr.msra.gmra.mxu1 %v212_v49 }
  0x93   :  { %v128_v51 = vpop.f32.mrf.mxu0 }
  0x94   :  { %v129_v52 = vadd.f32 %v825_v40, %v128_v51 }
  0x96   :  { %583 = vmatmul.msk.bf16.gmra.mxu0 %vm70_vm1, %v61_v50  ;;  %v189_v55 = vmax.f32 %v129_v52, 0.0 }
  0x9b   :  { %v130_v53 = vpop.f32.mrf.mxu0 }
  0x9c   :  { %v131_v54 = vadd.f32 %v825_v40, %v130_v53 }
  0x9e   :  { %v190_v56 = vmax.f32 %v131_v54, 0.0 }
  0xa0   :  { %v213_v59 = vpack.c.bf16 %v190_v56, %v189_v55 }
  0xa2   :  { %306 = vmatmul.bf16.gmra.mxu1 %v213_v59 }
  0xa3   :  { %v133_v61 = vpop.f32.mrf.mxu0 }
  0xa4   :  { %v134_v0 = vadd.f32 %v825_v40, %v133_v61 }
  0xa6   :  { %584 = vmatmul.msk.bf16.gmra.mxu0 %vm70_vm1, %v62_v60  ;;  %v191_v3 = vmax.f32 %v134_v0, 0.0 }
  0xab   :  { %v135_v1 = vpop.f32.mrf.mxu0 }
  0xac   :  { %v136_v2 = vadd.f32 %v825_v40, %v135_v1 }
  0xae   :  { %v192_v4 = vmax.f32 %v136_v2, 0.0 }
  0xb0   :  { %v214_v5 = vpack.c.bf16 %v192_v4, %v191_v3 }
  0xb2   :  { %311 = vmatmul.bf16.gmra.mxu1 %v214_v5 }
  0xb3   :  { %v138_v6 = vpop.f32.mrf.mxu0 }
  0xb4   :  { %v139_v7 = vadd.f32 %v825_v40, %v138_v6 }
  0xb6   :  { %v193_v10 = vmax.f32 %v139_v7, 0.0 }
  0xbb   :  { %v140_v8 = vpop.f32.mrf.mxu0 }
  0xbc   :  { %v141_v9 = vadd.f32 %v825_v40, %v140_v8 }
  0xbe   :  { %v194_v11 = vmax.f32 %v141_v9, 0.0 }
  0xc0   :  { %v215_v12 = vpack.c.bf16 %v194_v11, %v193_v10  ;;  %v180_v11 = vpop.f32.mrf.mxu3 }
  0xc1   :  { %v181_v30 = vadd.f32 %v825_v40, %v180_v11 }
  0xc2   :  { %316 = vmatmul.bf16.gmra.mxu1 %v215_v12 }
  0xc3   :  { %v143_v13 = vpop.f32.mrf.mxu0  ;;  %v210_v35 = vmax.f32 %v181_v30, 0.0 }
  0xc4   :  { %v144_v14 = vadd.f32 %v825_v40, %v143_v13 }
  0xc6   :  { %v195_v17 = vmax.f32 %v144_v14, 0.0 }
  0xcb   :  { %v145_v15 = vpop.f32.mrf.mxu0 }
  0xcc   :  { %v146_v16 = vadd.f32 %v825_v40, %v145_v15 }
  0xce   :  { %v196_v18 = vmax.f32 %v146_v16, 0.0 }
  0xd0   :  { %v216_v19 = vpack.c.bf16 %v196_v18, %v195_v17 }
  0xd2   :  { %321 = vmatmul.bf16.gmra.mxu1 %v216_v19  ;;  %v183_v19 = vpop.f32.mrf.mxu3 }
  0xd3   :  { %v148_v20 = vpop.f32.mrf.mxu0 }
  0xd4   :  { %v149_v21 = vadd.f32 %v825_v40, %v148_v20 }
  0xd6   :  { %v197_v25 = vmax.f32 %v149_v21, 0.0 }
  0xdb   :  { %v150_v22 = vpop.f32.mrf.mxu0 }
  0xdc   :  { %v151_v23 = vadd.f32 %v825_v40, %v150_v22 }
  0xde   :  { %v198_v26 = vmax.f32 %v151_v23, 0.0 }
  0xe0   :  { %v217_v27 = vpack.c.bf16 %v198_v26, %v197_v25  ;;  %v185_v26 = vpop.f32.mrf.mxu3 }
  0xe2   :  { %326 = vmatmul.bf16.gmra.mxu1 %v217_v27 }
  0xe3   :  { %v153_v29 = vpop.f32.mrf.mxu0 }
  0xe4   :  { %v154_v32 = vadd.f32 %v825_v40, %v153_v29  ;;  %v179_v29 = vadd.f32 %v825_v40, %v178_v63 }
  0xe6   :  { %v199_v36 = vmax.f32 %v154_v32, 0.0 }
  0xeb   :  { %v155_v33 = vpop.f32.mrf.mxu0 }
  0xec   :  { %v156_v34 = vadd.f32 %v825_v40, %v155_v33 }
  0xee   :  { %v200_v37 = vmax.f32 %v156_v34, 0.0  ;;  %v209_v34 = vmax.f32 %v179_v29, 0.0 }
  0xf0   :  { %v218_v38 = vpack.c.bf16 %v200_v37, %v199_v36 }
  0xf2   :  { %331 = vmatmul.bf16.gmra.mxu1 %v218_v38  ;;  %v223_v38 = vpack.c.bf16 %v210_v35, %v209_v34 }
  0xf3   :  { %v158_v41 = vpop.f32.mrf.mxu0 }
  0xf4   :  { %v159_v44 = vadd.f32 %v825_v40, %v158_v41  ;;  %v184_v41 = vadd.f32 %v825_v40, %v183_v19 }
  0xf6   :  { %v201_v47 = vmax.f32 %v159_v44, 0.0 }
  0xfb   :  { %v160_v45 = vpop.f32.mrf.mxu0 }
  0xfc   :  { %v161_v46 = vadd.f32 %v825_v40, %v160_v45 }
  0xfe   :  { %v202_v48 = vmax.f32 %v161_v46, 0.0  ;;  %v211_v46 = vmax.f32 %v184_v41, 0.0 }
 0x100   :  { %v219_v49 = vpack.c.bf16 %v202_v48, %v201_v47  ;;  %v224_v48 = vpack.c.bf16 %v211_v46, %v211_v46 }
 0x102   :  { %336 = vmatmul.bf16.gmra.mxu1 %v219_v49 }
 0x103   :  { %v163_v50 = vpop.f32.mrf.mxu0 }
 0x104   :  { %v164_v51 = vadd.f32 %v825_v40, %v163_v50 }
 0x106   :  { %v203_v54 = vmax.f32 %v164_v51, 0.0 }
 0x10b   :  { %v165_v52 = vpop.f32.mrf.mxu0 }
 0x10c   :  { %v166_v53 = vadd.f32 %v825_v40, %v165_v52 }
 0x10e   :  { %v204_v55 = vmax.f32 %v166_v53, 0.0 }
 0x10f   :  { %v302_v56 = vpop.f32.mrf.mxu1 }
 0x110   :  { %v220_v57 = vpack.c.bf16 %v204_v55, %v203_v54  ;;  %v303_v60 = vadd.f32 %v892_v58, %v302_v56 }
 0x112   :  { %341 = vmatmul.bf16.gmra.mxu1 %v220_v57  ;;  %v366_v0 = vmax.f32 %v303_v60, 0.0 }
 0x113   :  { %v168_v59 = vpop.f32.mrf.mxu0 }
 0x114   :  { %v169_v1 = vadd.f32 %v825_v40, %v168_v59 }
 0x116   :  { %v205_v6 = vmax.f32 %v169_v1, 0.0 }
 0x117   :  { %v304_v61 = vpop.f32.mrf.mxu1 }
 0x118   :  { %v305_v62 = vadd.f32 %v892_v58, %v304_v61 }
 0x11a   :  { %v367_v2 = vmax.f32 %v305_v62, 0.0 }
 0x11b   :  { %v170_v3 = vpop.f32.mrf.mxu0 }
 0x11c   :  { %v171_v4 = vadd.f32 %v825_v40, %v170_v3  ;;  %v391_v5 = vpack.c.bf16 %v367_v2, %v366_v0 }
 0x11e   :  { %v206_v7 = vmax.f32 %v171_v4, 0.0  ;;  %480 = vmatmul.bf16.vlgmr.msra.gmra.mxu2 %v391_v5 }
 0x11f   :  { %v307_v8 = vpop.f32.mrf.mxu1 }
 0x120   :  { %v221_v9 = vpack.c.bf16 %v206_v7, %v205_v6  ;;  %v308_v12 = vadd.f32 %v892_v58, %v307_v8 }
 0x122   :  { %346 = vmatmul.bf16.gmra.mxu1 %v221_v9  ;;  %v368_v15 = vmax.f32 %v308_v12, 0.0 }
 0x123   :  { %v173_v10 = vpop.f32.mrf.mxu0 }
 0x124   :  { %v174_v16 = vadd.f32 %v825_v40, %v173_v10 }
 0x126   :  { %v207_v22 = vmax.f32 %v174_v16, 0.0 }
 0x127   :  { %v309_v13 = vpop.f32.mrf.mxu1 }
 0x128   :  { %v310_v14 = vadd.f32 %v892_v58, %v309_v13 }
 0x12a   :  { %v369_v17 = vmax.f32 %v310_v14, 0.0 }
 0x12b   :  { %v175_v18 = vpop.f32.mrf.mxu0 }
 0x12c   :  { %v176_v20 = vadd.f32 %v825_v40, %v175_v18  ;;  %v392_v21 = vpack.c.bf16 %v369_v17, %v368_v15 }
 0x12e   :  { %v208_v23 = vmax.f32 %v176_v20, 0.0  ;;  %485 = vmatmul.bf16.gmra.mxu2 %v392_v21  ;;  %v922_v20 = vld [vmem:[%s1037_s6] ss:$0 sm:$0xff] }
 0x12f   :  { %v312_v24 = vpop.f32.mrf.mxu1 }
 0x130   :  { %v222_v25 = vpack.c.bf16 %v208_v23, %v207_v22  ;;  %v313_v27 = vadd.f32 %v892_v58, %v312_v24 }
 0x132   :  { %351 = vmatmul.bf16.vlgmr.msrb.gmra.mxu3 %v222_v25  ;;  %v370_v32 = vmax.f32 %v313_v27, 0.0 }
 0x137   :  { %v314_v28 = vpop.f32.mrf.mxu1 }
 0x138   :  { %v315_v31 = vadd.f32 %v892_v58, %v314_v28 }
 0x13a   :  { %v371_v33 = vmax.f32 %v315_v31, 0.0 }
 0x13c   :  { %v393_v36 = vpack.c.bf16 %v371_v33, %v370_v32 }
 0x13e   :  { %490 = vmatmul.bf16.gmra.mxu2 %v393_v36 }
 0x13f   :  { %v317_v37 = vpop.f32.mrf.mxu1 }
 0x140   :  { %v318_v39 = vadd.f32 %v892_v58, %v317_v37 }
 0x142   :  { %356 = vmatmul.bf16.gmra.mxu3 %v223_v38  ;;  %v372_v44 = vmax.f32 %v318_v39, 0.0 }
 0x147   :  { %v319_v42 = vpop.f32.mrf.mxu1 }
 0x148   :  { %v320_v43 = vadd.f32 %v892_v58, %v319_v42 }
 0x14a   :  { %v373_v45 = vmax.f32 %v320_v43, 0.0 }
 0x14c   :  { %v394_v47 = vpack.c.bf16 %v373_v45, %v372_v44 }
 0x14e   :  { %495 = vmatmul.bf16.gmra.mxu2 %v394_v47 }
 0x14f   :  { %v322_v49 = vpop.f32.mrf.mxu1 }
 0x150   :  { %v323_v50 = vadd.f32 %v892_v58, %v322_v49 }
 0x152   :  { %361 = vmatmul.bf16.gmra.mxu3 %v224_v48  ;;  %v374_v53 = vmax.f32 %v323_v50, 0.0 }
 0x157   :  { %v324_v51 = vpop.f32.mrf.mxu1 }
 0x158   :  { %v325_v52 = vadd.f32 %v892_v58, %v324_v51 }
 0x15a   :  { %v375_v54 = vmax.f32 %v325_v52, 0.0 }
 0x15c   :  { %v395_v55 = vpack.c.bf16 %v375_v54, %v374_v53 }
 0x15e   :  { %500 = vmatmul.bf16.gmra.mxu2 %v395_v55 }
 0x15f   :  { %v327_v40 = vpop.f32.mrf.mxu1 }
 0x160   :  { %v328_v56 = vadd.f32 %v892_v58, %v327_v40 }
 0x162   :  { %v376_v60 = vmax.f32 %v328_v56, 0.0 }
 0x167   :  { %v329_v57 = vpop.f32.mrf.mxu1 }
 0x168   :  { %v330_v59 = vadd.f32 %v892_v58, %v329_v57 }
 0x16a   :  { %v377_v61 = vmax.f32 %v330_v59, 0.0 }
 0x16c   :  { %v396_v62 = vpack.c.bf16 %v377_v61, %v376_v60 }
 0x16e   :  { %505 = vmatmul.bf16.gmra.mxu2 %v396_v62 }
 0x16f   :  { %v332_v63 = vpop.f32.mrf.mxu1 }
 0x170   :  { %v333_v0 = vadd.f32 %v892_v58, %v332_v63 }
 0x172   :  { %v378_v3 = vmax.f32 %v333_v0, 0.0 }
 0x177   :  { %v334_v1 = vpop.f32.mrf.mxu1 }
 0x178   :  { %v335_v2 = vadd.f32 %v892_v58, %v334_v1 }
 0x17a   :  { %v379_v4 = vmax.f32 %v335_v2, 0.0 }
 0x17c   :  { %v397_v5 = vpack.c.bf16 %v379_v4, %v378_v3 }
 0x17e   :  { %510 = vmatmul.bf16.gmra.mxu2 %v397_v5 }
 0x17f   :  { %v337_v6 = vpop.f32.mrf.mxu1 }
 0x180   :  { %v338_v7 = vadd.f32 %v892_v58, %v337_v6 }
 0x182   :  { %v380_v10 = vmax.f32 %v338_v7, 0.0 }
 0x187   :  { %v339_v8 = vpop.f32.mrf.mxu1 }
 0x188   :  { %v340_v9 = vadd.f32 %v892_v58, %v339_v8 }
 0x18a   :  { %v381_v11 = vmax.f32 %v340_v9, 0.0 }
 0x18c   :  { %v398_v12 = vpack.c.bf16 %v381_v11, %v380_v10 }
 0x18e   :  { %515 = vmatmul.bf16.gmra.mxu2 %v398_v12 }
 0x18f   :  { %v342_v13 = vpop.f32.mrf.mxu1 }
 0x190   :  { %v343_v14 = vadd.f32 %v892_v58, %v342_v13 }
 0x192   :  { %v382_v17 = vmax.f32 %v343_v14, 0.0 }
 0x197   :  { %v344_v15 = vpop.f32.mrf.mxu1 }
 0x198   :  { %v345_v16 = vadd.f32 %v892_v58, %v344_v15 }
 0x19a   :  { %v383_v18 = vmax.f32 %v345_v16, 0.0 }
 0x19c   :  { %v399_v19 = vpack.c.bf16 %v383_v18, %v382_v17 }
 0x19e   :  { %520 = vmatmul.bf16.gmra.mxu2 %v399_v19 }
 0x19f   :  { %v347_v21 = vpop.f32.mrf.mxu1 }
 0x1a0   :  { %v348_v24 = vadd.f32 %v892_v58, %v347_v21 }
 0x1a1   :  { %v481_v22 = vpop.f32.mrf.mxu2 }
 0x1a2   :  { %v482_v23 = vadd.f32 %v922_v20, %v481_v22  ;;  %v384_v28 = vmax.f32 %v348_v24, 0.0 }
 0x1a4   :  { %545 = vst [vmem:[%s1038_s7] sm:$0xff] %v482_v23 }
 0x1a7   :  { %v349_v25 = vpop.f32.mrf.mxu1 }
 0x1a8   :  { %v350_v26 = vadd.f32 %v892_v58, %v349_v25 }
 0x1a9   :  { %v483_v27 = vpop.f32.mrf.mxu2 }
 0x1aa   :  { %v385_v29 = vmax.f32 %v350_v26, 0.0  ;;  %v484_v30 = vadd.f32 %v922_v20, %v483_v27 }
 0x1ac   :  { %546 = vst [vmem:[%s1038_s7 + $0x8] sm:$0xff] %v484_v30  ;;  %v400_v31 = vpack.c.bf16 %v385_v29, %v384_v28 }
 0x1ae   :  { %525 = vmatmul.bf16.gmra.mxu2 %v400_v31 }
 0x1b1   :  { %v486_v32 = vpop.f32.mrf.mxu2 }
 0x1b2   :  { %v487_v33 = vadd.f32 %v922_v20, %v486_v32 }
 0x1b4   :  { %547 = vst [vmem:[%s1038_s7 + $0x10] sm:$0xff] %v487_v33 }
 0x1b5   :  { %v352_v34 = vpop.f32.mrf.mxu3 }
 0x1b6   :  { %v353_v37 = vadd.f32 %v892_v58, %v352_v34 }
 0x1b8   :  { %v386_v41 = vmax.f32 %v353_v37, 0.0 }
 0x1b9   :  { %v488_v35 = vpop.f32.mrf.mxu2 }
 0x1ba   :  { %v489_v36 = vadd.f32 %v922_v20, %v488_v35 }
 0x1bc   :  { %548 = vst [vmem:[%s1038_s7 + $0x18] sm:$0xff] %v489_v36 }
 0x1bd   :  { %v354_v38 = vpop.f32.mrf.mxu3 }
 0x1be   :  { %v355_v39 = vadd.f32 %v892_v58, %v354_v38 }
 0x1c0   :  { %v387_v42 = vmax.f32 %v355_v39, 0.0 }
 0x1c1   :  { %v491_v43 = vpop.f32.mrf.mxu2 }
 0x1c2   :  { %v401_v44 = vpack.c.bf16 %v387_v42, %v386_v41  ;;  %v492_v45 = vadd.f32 %v922_v20, %v491_v43 }
 0x1c4   :  { %549 = vst [vmem:[%s1038_s7 + $0x20] sm:$0xff] %v492_v45  ;;  %530 = vmatmul.bf16.vlgmr.msra.gmra.mxu3 %v401_v44 }
 0x1c5   :  { %v357_v46 = vpop.f32.mrf.mxu3 }
 0x1c6   :  { %v358_v49 = vadd.f32 %v892_v58, %v357_v46 }
 0x1c8   :  { %v388_v52 = vmax.f32 %v358_v49, 0.0 }
 0x1c9   :  { %v493_v47 = vpop.f32.mrf.mxu2 }
 0x1ca   :  { %v494_v48 = vadd.f32 %v922_v20, %v493_v47 }
 0x1cc   :  { %550 = vst [vmem:[%s1038_s7 + $0x28] sm:$0xff] %v494_v48 }
 0x1cd   :  { %v359_v50 = vpop.f32.mrf.mxu3 }
 0x1ce   :  { %v360_v51 = vadd.f32 %v892_v58, %v359_v50 }
 0x1d0   :  { %v389_v53 = vmax.f32 %v360_v51, 0.0 }
 0x1d1   :  { %v496_v54 = vpop.f32.mrf.mxu2 }
 0x1d2   :  { %v497_v55 = vadd.f32 %v922_v20, %v496_v54  ;;  %v402_v40 = vpack.c.bf16 %v389_v53, %v388_v52 }
 0x1d4   :  { %551 = vst [vmem:[%s1038_s7 + $0x30] sm:$0xff] %v497_v55  ;;  %535 = vmatmul.bf16.gmra.mxu3 %v402_v40 }
 0x1d5   :  { %v362_v56 = vpop.f32.mrf.mxu3 }
 0x1d6   :  { %v363_v57 = vadd.f32 %v892_v58, %v362_v56 }
 0x1d8   :  { %v390_v61 = vmax.f32 %v363_v57, 0.0 }
 0x1d9   :  { %v498_v59 = vpop.f32.mrf.mxu2 }
 0x1da   :  { %v499_v60 = vadd.f32 %v922_v20, %v498_v59  ;;  %v403_v63 = vpack.c.bf16 %v390_v61, %v390_v61 }
 0x1dc   :  { %552 = vst [vmem:[%s1038_s7 + $0x38] sm:$0xff] %v499_v60 }
 0x1dd   :  { %v364_v62 = vpop.f32.mrf.mxu3 }
 0x1e1   :  { %v501_v0 = vpop.f32.mrf.mxu2 }
 0x1e2   :  { %v502_v1 = vadd.f32 %v922_v20, %v501_v0 }
 0x1e4   :  { %553 = vst [vmem:[%s1038_s7 + $0x40] sm:$0xff] %v502_v1  ;;  %540 = vmatmul.bf16.gmra.mxu3 %v403_v63 }
 0x1e9   :  { %v503_v2 = vpop.f32.mrf.mxu2 }
 0x1ea   :  { %v504_v58 = vadd.f32 %v922_v20, %v503_v2 }
 0x1ec   :  { %554 = vst [vmem:[%s1038_s7 + $0x48] sm:$0xff] %v504_v58 }
 0x1f1   :  { %v506_v3 = vpop.f32.mrf.mxu2 }
 0x1f2   :  { %v507_v4 = vadd.f32 %v922_v20, %v506_v3 }
 0x1f4   :  { %555 = vst [vmem:[%s1038_s7 + $0x50] sm:$0xff] %v507_v4 }
 0x1f9   :  { %v508_v5 = vpop.f32.mrf.mxu2 }
 0x1fa   :  { %v509_v6 = vadd.f32 %v922_v20, %v508_v5 }
 0x1fc   :  { %556 = vst [vmem:[%s1038_s7 + $0x58] sm:$0xff] %v509_v6 }
 0x201   :  { %v511_v7 = vpop.f32.mrf.mxu2 }
 0x202   :  { %v512_v8 = vadd.f32 %v922_v20, %v511_v7 }
 0x204   :  { %557 = vst [vmem:[%s1038_s7 + $0x60] sm:$0xff] %v512_v8 }
 0x209   :  { %v513_v9 = vpop.f32.mrf.mxu2 }
 0x20a   :  { %v514_v10 = vadd.f32 %v922_v20, %v513_v9 }
 0x20c   :  { %558 = vst [vmem:[%s1038_s7 + $0x68] sm:$0xff] %v514_v10 }
 0x211   :  { %v516_v11 = vpop.f32.mrf.mxu2 }
 0x212   :  { %v517_v12 = vadd.f32 %v922_v20, %v516_v11 }
 0x214   :  { %559 = vst [vmem:[%s1038_s7 + $0x70] sm:$0xff] %v517_v12 }
 0x219   :  { %v518_v13 = vpop.f32.mrf.mxu2 }
 0x21a   :  { %v519_v14 = vadd.f32 %v922_v20, %v518_v13 }
 0x21c   :  { %560 = vst [vmem:[%s1038_s7 + $0x78] sm:$0xff] %v519_v14 }
 0x221   :  { %v521_v15 = vpop.f32.mrf.mxu2 }
 0x222   :  { %v522_v16 = vadd.f32 %v922_v20, %v521_v15 }
 0x224   :  { %561 = vst [vmem:[%s1038_s7 + $0x80] sm:$0xff] %v522_v16 }
 0x229   :  { %v523_v17 = vpop.f32.mrf.mxu2 }
 0x22a   :  { %v524_v18 = vadd.f32 %v922_v20, %v523_v17 }
 0x22c   :  { %562 = vst [vmem:[%s1038_s7 + $0x88] sm:$0xff] %v524_v18 }
 0x231   :  { %v526_v19 = vpop.f32.mrf.mxu2 }
 0x232   :  { %v527_v21 = vadd.f32 %v922_v20, %v526_v19 }
 0x234   :  { %563 = vst [vmem:[%s1038_s7 + $0x90] sm:$0xff] %v527_v21 }
 0x239   :  { %v528_v22 = vpop.f32.mrf.mxu2 }
 0x23a   :  { %v529_v23 = vadd.f32 %v922_v20, %v528_v22 }
 0x23c   :  { %564 = vst [vmem:[%s1038_s7 + $0x98] sm:$0xff] %v529_v23 }
 0x247   :  { %v531_v24 = vpop.f32.mrf.mxu3 }
 0x248   :  { %v532_v25 = vadd.f32 %v922_v20, %v531_v24 }
 0x24a   :  { %565 = vst [vmem:[%s1038_s7 + $0xa0] sm:$0xff] %v532_v25 }
 0x24f   :  { %v533_v26 = vpop.f32.mrf.mxu3 }
 0x250   :  { %v534_v27 = vadd.f32 %v922_v20, %v533_v26 }
 0x252   :  { %566 = vst [vmem:[%s1038_s7 + $0xa8] sm:$0xff] %v534_v27 }
 0x257   :  { %v536_v28 = vpop.f32.mrf.mxu3 }
 0x258   :  { %v537_v29 = vadd.f32 %v922_v20, %v536_v28 }
 0x25a   :  { %567 = vst [vmem:[%s1038_s7 + $0xb0] sm:$0xff] %v537_v29 }
 0x25f   :  { %v538_v30 = vpop.f32.mrf.mxu3 }
 0x260   :  { %v539_v31 = vadd.f32 %v922_v20, %v538_v30 }
 0x262   :  { %568 = vst [vmem:[%s1038_s7 + $0xb8] sm:$0xff] %v539_v31 }
 0x267   :  { %v541_v32 = vpop.f32.mrf.mxu3 }
 0x268   :  { %v542_v33 = vadd.f32 %v922_v20, %v541_v32 }
 0x26a   :  { %569 = vst [vmem:[%s1038_s7 + $0xc0] sm:$0xff] %v542_v33 }
 0x26f   :  { %v543_v34 = vpop.f32.mrf.mxu3 }

</bundles_post_ra>
